<compile_context>
chip_gen: v7x
topology: tpu7x:2x2x1
jax: 0.10.0
libtpu: 0.0.40
codegen_flags: <defaults>
</compile_context>

<pallas_src>
import functools

import numpy as np
import jax
import jax.numpy as jnp
from jax import lax
from jax.experimental import pallas as pl
from jax.experimental.pallas import tpu as pltpu

BN_EPS = 1e-5


def _fused_kernel(x_ref, p_ref, o_ref, *, N, Cin, Cout, H, W):
    # x_ref: (N*Cin,  H*W) f32 -- NCHW input with spatial flattened onto the lane axis
    # p_ref: (rows,   H*W) f32 -- packed params, see prepare_param_slab()
    # o_ref: (N*Cout, H*W) f32 -- result on the full HxW grid; columns with i==H-1 or
    #                             j==W-1 are don't-care (cropped outside the kernel)
    HW = H * W
    NCin = N * Cin
    NCout = N * Cout
    inv_cnt = 1.0 / float(N * (H - 1) * (W - 1))

    x = x_ref[...]                                   # already f32, no cast

    # The 4 taps of the k=2 transposed conv read x[i+a, j+b]; realised as XLU lane
    # rotations of the flattened spatial axis.  Wraparound / cross-row bleed only lands
    # in the masked (cropped) columns -- valid ONLY for k=2, stride=1, padding=(1,1).
    t00 = x                                          # x[i,   j  ]
    t01 = pltpu.roll(x, shift=HW - 1, axis=1)        # x[i,   j+1]
    t10 = pltpu.roll(x, shift=HW - W, axis=1)        # x[i+1, j  ]
    t11 = pltpu.roll(x, shift=HW - W - 1, axis=1)    # x[i+1, j+1]

    # Block-diagonal (over batch) tap weights: 4 small MXU contractions whose sum lands
    # directly in the (N*Cout, H*W) output layout.  No im2col concat / unshuffle.
    def tap(k, t):
        wk = p_ref[0:NCout, k * NCin:(k + 1) * NCin]                 # (N*Cout, N*Cin)
        return jnp.dot(wk, t, preferred_element_type=jnp.float32)

    y = tap(0, t00) + tap(1, t01) + tap(2, t10) + tap(3, t11)        # (N*Cout, HW)

    # ReLU + precomputed validity mask (zeros wrap/crop columns before the BN sums).
    valid = p_ref[NCout:NCout + 1, :]                                # (1, HW)
    v = jnp.maximum(y, 0.0) * valid

    # BatchNorm2d (training mode): single-pass biased batch stats per channel, in f32.
    s1 = jnp.sum(v, axis=1, keepdims=True)                           # (N*Cout, 1)
    s2 = jnp.sum(v * v, axis=1, keepdims=True)
    s1c, s2c = s1[0:Cout], s2[0:Cout]
    for n in range(1, N):                                            # fold batch row-blocks
        s1c = s1c + s1[n * Cout:(n + 1) * Cout]
        s2c = s2c + s2[n * Cout:(n + 1) * Cout]
    mean = s1c * inv_cnt
    var = s2c * inv_cnt - mean * mean
    gamma = p_ref[0:Cout, 4 * NCin:4 * NCin + 1]                     # (Cout, 1)
    beta = p_ref[0:Cout, 4 * NCin + 1:4 * NCin + 2]                  # (Cout, 1)
    scale = gamma * lax.rsqrt(var + BN_EPS)
    shift = beta - mean * scale
    scale_r = jnp.concatenate([scale] * N, axis=0)                   # (N*Cout, 1)
    shift_r = jnp.concatenate([shift] * N, axis=0)

    # Single unmasked full-tile (N*Cout, HW) store.
    o_ref[...] = v * scale_r + shift_r


def prepare_param_slab(w_conv, gamma, beta, *, N, H, W):
    """One-time host-side packing of all kernel parameters into a single f32 slab.

    Layout (Cin/Cout from w_conv, NCin=N*Cin, NCout=N*Cout, HW=H*W):
      [0:NCout, k*NCin:(k+1)*NCin]  block-diagonal weight for tap k (k = a*2+b)
      [0:Cout,  4*NCin]             gamma
      [0:Cout,  4*NCin + 1]         beta
      [NCout,   0:HW]               validity mask (1.0 where i < H-1 and j < W-1)
    """
    w = np.asarray(w_conv, dtype=np.float32)         # (Cin, Cout, 2, 2) torch ConvTranspose2d layout
    Cin, Cout, kh, kw = w.shape
    assert (kh, kw) == (2, 2), "kernel is specialised to kernel_size=(2,2), stride=1, padding=(1,1)"
    NCin, NCout, HW = N * Cin, N * Cout, H * W
    assert HW % 128 == 0 and HW >= 4 * NCin + 2, "param slab / lane layout assumptions violated"

    rows = ((NCout + 1 + 7) // 8) * 8
    slab = np.zeros((rows, HW), dtype=np.float32)

    # Equivalent VALID convolution: out[oc, i, j] += x[ic, i+a, j+b] * W[ic, oc, 1-a, 1-b]
    for k, (a, b) in enumerate(((0, 0), (0, 1), (1, 0), (1, 1))):
        w_tap = w[:, :, 1 - a, 1 - b].T              # (Cout, Cin)
        for n in range(N):                           # block diagonal over the batch
            slab[n * Cout:(n + 1) * Cout,
                 k * NCin + n * Cin:k * NCin + (n + 1) * Cin] = w_tap

    slab[0:Cout, 4 * NCin] = np.asarray(gamma, dtype=np.float32)
    slab[0:Cout, 4 * NCin + 1] = np.asarray(beta, dtype=np.float32)

    i = np.arange(HW) // W
    j = np.arange(HW) % W
    slab[NCout, :] = ((i < H - 1) & (j < W - 1)).astype(np.float32)
    return jnp.asarray(slab)


@functools.partial(jax.jit, static_argnames=("cout",))
def model_forward(x_nchw, param_slab, *, cout):
    """x_nchw: (N, Cin, H, W) f32; param_slab from prepare_param_slab()."""
    N, Cin, H, W = x_nchw.shape
    HW = H * W

    # Free (bitcast) reshape: NCHW with spatial flattened onto the lane axis.
    x2d = x_nchw.astype(jnp.float32).reshape(N * Cin, HW)

    kernel = functools.partial(_fused_kernel, N=N, Cin=Cin, Cout=cout, H=H, W=W)
    vmem = pl.BlockSpec(memory_space=pltpu.MemorySpace.VMEM)
    out2d = pl.pallas_call(
        kernel,
        out_shape=jax.ShapeDtypeStruct((N * cout, HW), jnp.float32),
        in_specs=[vmem, vmem],
        out_specs=vmem,
    )(x2d, param_slab)

    # Free reshape + tiny crop of the padded spatial row/column (fused under jit).
    return out2d.reshape(N, cout, H, W)[:, :, :H - 1, :W - 1]


def _reference_forward(x_nchw, w_conv, gamma, beta):
    """Pure-JAX reference of the same PyTorch forward pass (training-mode BN)."""
    # K[oc, ic, a, b] = W[ic, oc, 1-a, 1-b]
    w_oihw = jnp.transpose(w_conv[:, :, ::-1, ::-1], (1, 0, 2, 3))
    v1 = lax.conv_general_dilated(
        x_nchw, w_oihw, window_strides=(1, 1), padding="VALID",
        dimension_numbers=("NCHW", "OIHW", "NCHW"))
    v2 = jnp.maximum(v1, 0.0)
    mean = jnp.mean(v2, axis=(0, 2, 3), keepdims=True)
    var = jnp.mean((v2 - mean) ** 2, axis=(0, 2, 3), keepdims=True)
    g = gamma.reshape(1, -1, 1, 1)
    b = beta.reshape(1, -1, 1, 1)
    return (v2 - mean) * lax.rsqrt(var + BN_EPS) * g + b


if __name__ == "__main__":
    key = jax.random.PRNGKey(0)
    k_x, k_w = jax.random.split(key)

    # Small shapes consistent with the module: C=8 fixed by ConvTranspose2d(8, 8); N=2, 16x16.
    N, C, H, W = 2, 8, 16, 16
    x = jax.random.normal(k_x, (N, C, H, W), dtype=jnp.float32)

    # ConvTranspose2d(8, 8, kernel_size=(2,2), bias=False) weight: (Cin, Cout, 2, 2)
    w_conv = 0.25 * jax.random.normal(k_w, (C, C, 2, 2), dtype=jnp.float32)
    # BatchNorm2d default affine params: gamma=1, beta=0
    gamma = jnp.ones((C,), dtype=jnp.float32)
    beta = jnp.zeros((C,), dtype=jnp.float32)

    # One-time parameter packing (host side), then the jitted forward.
    # TODO(synk): BatchNorm running_mean/running_var buffer updates (training-time side
    # effect that does not affect this forward's output) are not modelled.
    slab = prepare_param_slab(w_conv, gamma, beta, N=N, H=H, W=W)

    out = jax.block_until_ready(model_forward(x, slab, cout=C))
    ref = jax.block_until_ready(_reference_forward(x, w_conv, gamma, beta))

    assert out.shape == (N, C, H - 1, W - 1), out.shape
    np.testing.assert_allclose(np.asarray(out), np.asarray(ref), rtol=1e-4, atol=1e-4)

    print("KERNEL_OK")
</pallas_src>

<mosaic_0001>
module attributes {stable_mosaic.version = 11 : i64} {
  func.func @_fused_kernel(%arg0: memref<16x256xf32, #tpu.memory_space<vmem>>, %arg1: memref<24x256xf32, #tpu.memory_space<vmem>>, %arg2: memref<16x256xf32, #tpu.memory_space<vmem>>) attributes {dimension_semantics = [], scalar_prefetch = 0 : i64, scratch_operands = 0 : i64, tpu.core_type = #tpu.core_type<tc>} {
    %c0 = arith.constant 0 : index
    %c0_0 = arith.constant 0 : index
    %0 = vector.load %arg0[%c0, %c0_0] : memref<16x256xf32, #tpu.memory_space<vmem>>, vector<16x256xf32>
    %c255_i32 = arith.constant 255 : i32
    %1 = tpu.dynamic_rotate %0 by %c255_i32 dim 1 : vector<16x256xf32>, i32 -> vector<16x256xf32>
    %c240_i32 = arith.constant 240 : i32
    %2 = tpu.dynamic_rotate %0 by %c240_i32 dim 1 : vector<16x256xf32>, i32 -> vector<16x256xf32>
    %c239_i32 = arith.constant 239 : i32
    %3 = tpu.dynamic_rotate %0 by %c239_i32 dim 1 : vector<16x256xf32>, i32 -> vector<16x256xf32>
    %c0_1 = arith.constant 0 : index
    %c0_2 = arith.constant 0 : index
    %4 = vector.load %arg1[%c0_1, %c0_2] : memref<24x256xf32, #tpu.memory_space<vmem>>, vector<16x16xf32>
    %cst = arith.constant dense<0.000000e+00> : vector<16x256xf32>
    %5 = tpu.matmul %4, %0, %cst {dimension_numbers = #tpu.dot_dimension_numbers<[1], [0], [0], [1], [0, 0, 1, 1], [], []>} : vector<16x16xf32>, vector<16x256xf32>, vector<16x256xf32> -> vector<16x256xf32>
    %c0_3 = arith.constant 0 : index
    %c16 = arith.constant 16 : index
    %6 = vector.load %arg1[%c0_3, %c16] : memref<24x256xf32, #tpu.memory_space<vmem>>, vector<16x16xf32>
    %cst_4 = arith.constant dense<0.000000e+00> : vector<16x256xf32>
    %7 = tpu.matmul %6, %1, %cst_4 {dimension_numbers = #tpu.dot_dimension_numbers<[1], [0], [0], [1], [0, 0, 1, 1], [], []>} : vector<16x16xf32>, vector<16x256xf32>, vector<16x256xf32> -> vector<16x256xf32>
    %8 = arith.addf %5, %7 : vector<16x256xf32>
    %c0_5 = arith.constant 0 : index
    %c32 = arith.constant 32 : index
    %9 = vector.load %arg1[%c0_5, %c32] : memref<24x256xf32, #tpu.memory_space<vmem>>, vector<16x16xf32>
    %cst_6 = arith.constant dense<0.000000e+00> : vector<16x256xf32>
    %10 = tpu.matmul %9, %2, %cst_6 {dimension_numbers = #tpu.dot_dimension_numbers<[1], [0], [0], [1], [0, 0, 1, 1], [], []>} : vector<16x16xf32>, vector<16x256xf32>, vector<16x256xf32> -> vector<16x256xf32>
    %11 = arith.addf %8, %10 : vector<16x256xf32>
    %c0_7 = arith.constant 0 : index
    %c48 = arith.constant 48 : index
    %12 = vector.load %arg1[%c0_7, %c48] : memref<24x256xf32, #tpu.memory_space<vmem>>, vector<16x16xf32>
    %cst_8 = arith.constant dense<0.000000e+00> : vector<16x256xf32>
    %13 = tpu.matmul %12, %3, %cst_8 {dimension_numbers = #tpu.dot_dimension_numbers<[1], [0], [0], [1], [0, 0, 1, 1], [], []>} : vector<16x16xf32>, vector<16x256xf32>, vector<16x256xf32> -> vector<16x256xf32>
    %14 = arith.addf %11, %13 : vector<16x256xf32>
    %c16_9 = arith.constant 16 : index
    %c0_10 = arith.constant 0 : index
    %15 = vector.load %arg1[%c16_9, %c0_10] : memref<24x256xf32, #tpu.memory_space<vmem>>, vector<1x256xf32>
    %cst_11 = arith.constant 0.000000e+00 : f32
    %16 = vector.broadcast %cst_11 : f32 to vector<16x256xf32>
    %17 = arith.maximumf %14, %16 : vector<16x256xf32>
    %18 = vector.broadcast %15 : vector<1x256xf32> to vector<16x256xf32>
    %19 = arith.mulf %17, %18 : vector<16x256xf32>
    %cst_12 = arith.constant dense<0.000000e+00> : vector<16xf32>
    %20 = vector.multi_reduction <add>, %19, %cst_12 [1] : vector<16x256xf32> to vector<16xf32>
    %21 = vector.shape_cast %20 : vector<16xf32> to vector<16x1xf32>
    %22 = arith.mulf %19, %19 : vector<16x256xf32>
    %cst_13 = arith.constant dense<0.000000e+00> : vector<16xf32>
    %23 = vector.multi_reduction <add>, %22, %cst_13 [1] : vector<16x256xf32> to vector<16xf32>
    %24 = vector.shape_cast %23 : vector<16xf32> to vector<16x1xf32>
    %25 = vector.extract_strided_slice %21 {offsets = [0, 0], sizes = [8, 1], strides = [1, 1]} : vector<16x1xf32> to vector<8x1xf32>
    %26 = vector.extract_strided_slice %24 {offsets = [0, 0], sizes = [8, 1], strides = [1, 1]} : vector<16x1xf32> to vector<8x1xf32>
    %27 = vector.extract_strided_slice %21 {offsets = [8, 0], sizes = [8, 1], strides = [1, 1]} : vector<16x1xf32> to vector<8x1xf32>
    %28 = arith.addf %25, %27 : vector<8x1xf32>
    %29 = vector.extract_strided_slice %24 {offsets = [8, 0], sizes = [8, 1], strides = [1, 1]} : vector<16x1xf32> to vector<8x1xf32>
    %30 = arith.addf %26, %29 : vector<8x1xf32>
    %cst_14 = arith.constant 0.00222222228 : f32
    %31 = vector.broadcast %cst_14 : f32 to vector<8x1xf32>
    %32 = arith.mulf %28, %31 : vector<8x1xf32>
    %cst_15 = arith.constant 0.00222222228 : f32
    %33 = vector.broadcast %cst_15 : f32 to vector<8x1xf32>
    %34 = arith.mulf %30, %33 : vector<8x1xf32>
    %35 = arith.mulf %32, %32 : vector<8x1xf32>
    %36 = arith.subf %34, %35 : vector<8x1xf32>
    %c0_16 = arith.constant 0 : index
    %c64 = arith.constant 64 : index
    %37 = vector.load %arg1[%c0_16, %c64] : memref<24x256xf32, #tpu.memory_space<vmem>>, vector<8x1xf32>
    %c0_17 = arith.constant 0 : index
    %c65 = arith.constant 65 : index
    %38 = vector.load %arg1[%c0_17, %c65] : memref<24x256xf32, #tpu.memory_space<vmem>>, vector<8x1xf32>
    %cst_18 = arith.constant 9.99999974E-6 : f32
    %39 = vector.broadcast %cst_18 : f32 to vector<8x1xf32>
    %40 = arith.addf %36, %39 : vector<8x1xf32>
    %41 = math.rsqrt %40 : vector<8x1xf32>
    %42 = arith.mulf %37, %41 : vector<8x1xf32>
    %43 = arith.mulf %32, %42 : vector<8x1xf32>
    %44 = arith.subf %38, %43 : vector<8x1xf32>
    %45 = tpu.concatenate %42, %42 in 0 : vector<8x1xf32>, vector<8x1xf32> -> vector<16x1xf32>
    %46 = tpu.concatenate %44, %44 in 0 : vector<8x1xf32>, vector<8x1xf32> -> vector<16x1xf32>
    %47 = vector.broadcast %45 : vector<16x1xf32> to vector<16x256xf32>
    %48 = arith.mulf %19, %47 : vector<16x256xf32>
    %49 = vector.broadcast %46 : vector<16x1xf32> to vector<16x256xf32>
    %50 = arith.addf %48, %49 : vector<16x256xf32>
    %c0_19 = arith.constant 0 : index
    %c0_20 = arith.constant 0 : index
    %51 = vector.load %arg2[%c0_19, %c0_20] : memref<16x256xf32, #tpu.memory_space<vmem>>, vector<16x256xf32>
    tpu.vector_store %arg2[%c0_19, %c0_20], %50 {strides = array<i32>} : memref<16x256xf32, #tpu.memory_space<vmem>>, vector<16x256xf32>,
    return
  }
}

</mosaic_0001>

<bundles_post_ra>
// kernel: model_forward.1
= control target key start
LH: loop header
LB: loop body
LE: loop exit
PB: predicated region body
PF: predicated region fallthrough
CT: control target
= control target key end

     0   :  { %s565_s17 = smov 112   ;;  %s566_s18 = smov 127   ;;  %v567_v6 = vmov 0.0   ;;  %v23_v11 = vlaneseq  ;;  %vm64_vm2 = vcmask 130048   ;;  %s685_s0 = inlined_call_operand.vmem [shape: f32[16,256], index: 0, kind: input, shape index: {}]   ;;  %s686_s1 = inlined_call_operand.vmem [shape: f32[24,256], index: 1, kind: input, shape index: {}]   ;;  %s687_s2 = inlined_call_operand.vmem [shape: f32[16,256], index: 2, kind: output, shape index: {}]  }
   0x1   :  { %v592_v0 = vld [vmem:[%s685_s0] sm:$0xff]  ;;  %v597_v1 = vld [vmem:[%s685_s0 + $0x10] sm:$0xff]  ;;  %v602_v2 = vld [vmem:[%s685_s0 + $0x8] sm:$0xff]  ;;  %133 = vmatprep.mubr.f32.mxu1 %v567_v6  ;;  %299 = vmatprep.mubr.f32.mxu0 %v567_v6  ;;  %s568_s20 = smov 96   ;;  %s569_s21 = smov 111  }
   0x2   :  { %v540_v3 = vpack.i.bf16 %v597_v1, %v592_v0  ;;  %v609_v4 = vld [vmem:[%s685_s0 + $0x18] sm:$0xff]  ;;  %v620_v8 = vld [vmem:[%s686_s1] sm:$0xff]  ;;  %v499_v9 = vpack.c.bf16 %v597_v1, %v592_v0  ;;  %v629_v10 = vld [vmem:[%s686_s1 + $0x10] sm:$0xff]  ;;  %s570_s24 = smov 80   ;;  %v24_v12 = vand.u32 127, %v23_v11  ;;  %v413_v55 = vshrl.u32 %v23_v11, 7 }
   0x3   :  { %v545_v5 = vpack.i.bf16 %v609_v4, %v602_v2  ;;  %v497_v7 = vpack.c.bf16 %v609_v4, %v602_v2  ;;  %v492_v57 = vld [vmem:[%s686_s1 + $0x20] ss:$8 sm:$0x3]  ;;  %s573_s1 = smov 1  }
   0x4   :  { %541 = vrot.lane.b32.xlu1 %v540_v3, %s565_s17  ;;  %531 = vrot.lane.b32.xlu0 %v540_v3, %s566_s18  ;;  %vm25_vm0 = vcmp.lt.s32.totalorder %v24_v12, 127  ;;  %vm38_vm1 = vcmp.lt.s32.totalorder %v24_v12, 112  ;;  %vm51_vm3 = vcmp.lt.s32.totalorder %v24_v12, 111  ;;  %v414_v56 = vsub.s32 0, %v413_v55 }
   0x5   :  { %v418_v58 = vsub.s32 1, %v413_v55 }
   0x6   :  { %v415_v63 = vrot.slane %v492_v57, %v414_v56 }
   0x7   :  { %v419_v2 = vrot.slane %v492_v57, %v418_v58 }
   0x8   :  { %546 = vrot.lane.b32.xlu1 %v545_v5, %s565_s17  ;;  %536 = vrot.lane.b32.xlu0 %v545_v5, %s566_s18 }
   0xc   :  { %227 = vrot.lane.b32.xlu1 %v620_v8, %s568_s20  ;;  %60 = vrot.lane.b32.xlu0 %v620_v8, %s565_s17 }
  0x10   :  { %556 = vrot.lane.b32.xlu1 %v545_v5, %s569_s21  ;;  %551 = vrot.lane.b32.xlu0 %v540_v3, %s569_s21 }
  0x14   :  { %229 = vrot.lane.b32.xlu1 %v629_v10, %s568_s20  ;;  %62 = vrot.lane.b32.xlu0 %v629_v10, %s565_s17 }
  0x18   :  { %316 = vrot.lane.b32.xlu0 %v620_v8, %s570_s24  ;;  %318 = vrot.lane.b32.xlu1 %v629_v10, %s570_s24 }
  0x76   :  { %v542_v13 = vpop.permute.xlu1 %541  ;;  %v532_v14 = vpop.permute.xlu0 %531 }
  0x77   :  { %v544_v15 = vunpack.i.h.bf16 %v542_v13  ;;  %v543_v16 = vunpack.i.l.bf16 %v542_v13  ;;  %v534_v17 = vunpack.i.h.bf16 %v532_v14  ;;  %v533_v18 = vunpack.i.l.bf16 %v532_v14 }
  0x7a   :  { %v547_v19 = vpop.permute.xlu1 %546  ;;  %v537_v20 = vpop.permute.xlu0 %536 }
  0x7b   :  { %v549_v21 = vunpack.i.h.bf16 %v547_v19  ;;  %v548_v22 = vunpack.i.l.bf16 %v547_v19  ;;  %v539_v23 = vunpack.i.h.bf16 %v537_v20  ;;  %v538_v24 = vunpack.i.l.bf16 %v537_v20 }
  0x7d   :  { %v28_v25 = vsel %vm25_vm0, %v538_v24, %v533_v18  ;;  %v29_v26 = vsel %vm25_vm0, %v539_v23, %v534_v17  ;;  %v41_v27 = vsel %vm38_vm1, %v548_v22, %v543_v16  ;;  %v42_v28 = vsel %vm38_vm1, %v549_v21, %v544_v15 }
  0x7e   :  { %v228_v29 = vpop.permute.xlu1 %227  ;;  %v61_v30 = vpop.permute.xlu0 %60  ;;  %v493_v31 = vpack.c.bf16 %v29_v26, %v28_v25  ;;  %v501_v32 = vpack.c.bf16 %v42_v28, %v41_v27  ;;  %v26_v33 = vsel %vm25_vm0, %v533_v18, %v538_v24  ;;  %v27_v34 = vsel %vm25_vm0, %v534_v17, %v539_v23 }
  0x7f   :  { %v495_v35 = vpack.c.bf16 %v27_v34, %v26_v33  ;;  %v39_v36 = vsel %vm38_vm1, %v543_v16, %v548_v22  ;;  %v40_v37 = vsel %vm38_vm1, %v544_v15, %v549_v21  ;;  %v571_v26 = vmov 64  }
  0x80   :  { %494 = vmatprep.subr.bf16.mxu1 %v493_v31  ;;  %502 = vmatprep.subr.bf16.mxu0 %v501_v32  ;;  %v503_v38 = vpack.c.bf16 %v40_v37, %v39_v36 }
  0x81   :  { %496 = vmatpush1.bf16.msra.mxu1 %v495_v35  ;;  %560 = vset.pattern.permute.xlu0 %v571_v26 }
  0x82   :  { %504 = vmatpush1.bf16.msra.mxu0 %v503_v38  ;;  %v557_v39 = vpop.permute.xlu1 %556  ;;  %v552_v40 = vpop.permute.xlu0 %551  ;;  %498 = vmatprep.subr.bf16.mxu1 %v497_v7  ;;  %v572_v38 = vmov 65  }
  0x83   :  { %v559_v41 = vunpack.i.h.bf16 %v557_v39  ;;  %v558_v42 = vunpack.i.l.bf16 %v557_v39  ;;  %v554_v43 = vunpack.i.h.bf16 %v552_v40  ;;  %v553_v44 = vunpack.i.l.bf16 %v552_v40  ;;  %561 = vset.pattern.permute.xlu1 %v572_v38 }
  0x84   :  { %484 = vmatmul.mubr.msk.f32.vlgmr.msra.gmra.mrb[0].mxu1 %vm64_vm2, %v61_v30 }
  0x85   :  { %v53_v45 = vsel %vm51_vm3, %v554_v43, %v559_v41  ;;  %v52_v46 = vsel %vm51_vm3, %v553_v44, %v558_v42  ;;  %488 = vmatmul.mubr.msk.f32.vlgmr.msra.gmra.mrb[0].mxu0 %vm64_vm2, %v228_v29  ;;  %139 = vmatprep.mubr.f32.mxu1 %v567_v6  ;;  %v54_v47 = vsel %vm51_vm3, %v558_v42, %v553_v44 }
  0x86   :  { %v507_v48 = vpack.c.bf16 %v53_v45, %v52_v46  ;;  %v230_v49 = vpop.permute.xlu1 %229  ;;  %305 = vmatprep.mubr.f32.mxu0 %v567_v6  ;;  %v63_v50 = vpop.permute.xlu0 %62  ;;  %v55_v51 = vsel %vm51_vm3, %v559_v41, %v554_v43  ;;  %500 = vmatpush1.bf16.msra.mxu1 %v499_v9 }
  0x87   :  { %v505_v52 = vpack.c.bf16 %v55_v51, %v54_v47 }
  0x88   :  { %485 = vmatmul.mubr.msk.f32.gmra.mrb[2].mxu1 %vm64_vm2, %v63_v50 }
  0x89   :  { %489 = vmatmul.mubr.msk.f32.gmra.mrb[2].mxu0 %vm64_vm2, %v230_v49  ;;  %506 = vmatprep.subr.bf16.mxu0 %v505_v52 }
  0x8a   :  { %508 = vmatpush1.bf16.msra.mxu0 %v507_v48  ;;  %388 = vmatprep.mubr.f32.mxu0 %v567_v6  ;;  %v317_v53 = vpop.permute.xlu0 %316  ;;  %v319_v54 = vpop.permute.xlu1 %318 }
  0x8b   :  { %214 = vmatprep.mubr.f32.mxu1 %v567_v6 }
  0x8c   :  { %486 = vmatmul.mubr.msk.f32.vlgmr.msra.gmra.mrb[0].mxu1 %vm64_vm2, %v620_v8 }
  0x8d   :  { %490 = vmatmul.mubr.msk.f32.vlgmr.msra.gmra.mrb[0].mxu0 %vm64_vm2, %v317_v53  ;;  %220 = vmatprep.mubr.f32.mxu1 %v567_v6 }
  0x8e   :  { %394 = vmatprep.mubr.f32.mxu0 %v567_v6 }
  0x90   :  { %487 = vmatmul.mubr.msk.f32.gmra.mrb[2].mxu1 %vm64_vm2, %v629_v10 }
  0x91   :  { %491 = vmatmul.mubr.msk.f32.gmra.mrb[2].mxu0 %vm64_vm2, %v319_v54 }
 0x15f   :  { %v216_v59 = vpop.f32.mrb[0].mxu1 }
 0x160   :  { %v390_v60 = vpop.f32.mrb[0].mxu0  ;;  %v218_v61 = vpop.f32.mrb[1].mxu1 }
 0x161   :  { %v509_v62 = vadd.f32 %v390_v60, %v216_v59  ;;  %v392_v0 = vpop.f32.mrb[1].mxu0 }
 0x162   :  { %v510_v1 = vadd.f32 %v392_v0, %v218_v61 }
 0x163   :  { %v407_v3 = vmax.f32 %v509_v62, 0.0  ;;  %v222_v4 = vpop.f32.mrb[2].mxu1 }
 0x164   :  { %v408_v5 = vmax.f32 %v510_v1, 0.0  ;;  %v396_v6 = vpop.f32.mrb[2].mxu0  ;;  %v224_v7 = vpop.f32.mrb[3].mxu1 }
 0x165   :  { %v422_v9 = vmul.f32 %v415_v63, %v407_v3  ;;  %v511_v10 = vadd.f32 %v396_v6, %v222_v4  ;;  %v398_v11 = vpop.f32.mrb[3].mxu0 }
 0x166   :  { %v423_v12 = vmul.f32 %v419_v2, %v408_v5  ;;  %v512_v13 = vadd.f32 %v398_v11, %v224_v7 }
 0x167   :  { %v409_v14 = vmax.f32 %v511_v10, 0.0  ;;  %v432_v17 = vmul.f32 %v422_v9, %v422_v9 }
 0x168   :  { %v410_v15 = vmax.f32 %v512_v13, 0.0  ;;  %v426_v16 = vadd.f32 %v423_v12, %v422_v9  ;;  %v433_v18 = vmul.f32 %v423_v12, %v423_v12 }
 0x169   :  { %v424_v19 = vmul.f32 %v415_v63, %v409_v14 }
 0x16a   :  { %v425_v20 = vmul.f32 %v419_v2, %v410_v15  ;;  %427 = vadd.xlane.f32.xlu0 %v426_v16  ;;  %v436_v21 = vadd.f32 %v433_v18, %v432_v17 }
 0x16b   :  { %v434_v23 = vmul.f32 %v424_v19, %v424_v19 }
 0x16c   :  { %v429_v22 = vadd.f32 %v425_v20, %v424_v19  ;;  %v435_v24 = vmul.f32 %v425_v20, %v425_v20 }
 0x16e   :  { %437 = vadd.xlane.f32.xlu0 %v436_v21  ;;  %430 = vadd.xlane.f32.xlu1 %v429_v22  ;;  %v439_v25 = vadd.f32 %v435_v24, %v434_v23 }
 0x172   :  { %440 = vadd.xlane.f32.xlu0 %v439_v25 }
 0x1f7   :  { %v428_v27 = vpop.xlane.xlu0 %427 }
 0x1fb   :  { %v438_v28 = vpop.xlane.xlu0 %437  ;;  %v431_v29 = vpop.xlane.xlu1 %430 }
 0x1fc   :  { %v442_v30 = vadd.f32 %v431_v29, %v428_v27 }
 0x1fe   :  { %v444_v31 = vmul.f32 0.0022222223, %v442_v30 }
 0x1ff   :  { %v441_v32 = vpop.xlane.xlu0 %440 }
 0x200   :  { %v443_v33 = vadd.f32 %v441_v32, %v438_v28  ;;  %v446_v34 = vmul.f32 %v444_v31, %v444_v31 }
 0x202   :  { %v445_v35 = vmul.f32 0.0022222223, %v443_v33 }
 0x204   :  { %v447_v36 = vsub.f32 %v445_v35, %v446_v34 }
 0x206   :  { %v449_v37 = vadd.f32 1e-05, %v447_v36 }
 0x208   :  { %563 = vrsqrt.f32 %v449_v37 }
 0x212   :  { %v564_v39 = vpop.eup %563 }
 0x213   :  { %v451_v40 = vmul.f32 %v564_v39, %v620_v8 }
 0x215   :  { %460 = vperm.xlu0 %560, %v451_v40   ;;  %v452_v41 = vmul.f32 %v451_v40, %v444_v31 }
 0x217   :  { %454 = vrot.lane.b32.xlu1 %v452_v41, %s573_s1 }
 0x219   :  { %562 = vset.pattern.permute.xlu0 %v572_v38 }
 0x289   :  { %v455_v42 = vpop.permute.xlu1 %454 }
 0x28a   :  { %v457_v43 = vsub.f32 %v620_v8, %v455_v42 }
 0x28c   :  { %469 = vperm.xlu1 %561, %v457_v43  }
 0x294   :  { %v461_v44 = vpop.permute.xlu0 %460 }
 0x295   :  { %v463_v45 = vmul.f32 %v461_v44, %v422_v9  ;;  %v464_v46 = vmul.f32 %v461_v44, %v423_v12  ;;  %v465_v47 = vmul.f32 %v461_v44, %v424_v19  ;;  %v466_v48 = vmul.f32 %v461_v44, %v425_v20 }
 0x30b   :  { %v470_v49 = vpop.permute.xlu1 %469 }
 0x30c   :  { %v472_v50 = vadd.f32 %v470_v49, %v463_v45  ;;  %v473_v51 = vadd.f32 %v470_v49, %v464_v46  ;;  %v474_v52 = vadd.f32 %v470_v49, %v465_v47  ;;  %v475_v53 = vadd.f32 %v470_v49, %v466_v48 }
 0x30e   :  { %476 = vst [vmem:[%s687_s2] sm:$0xff] %v472_v50  ;;  %477 = vst [vmem:[%s687_s2 + $0x8] sm:$0xff] %v473_v51 }
 0x30f   :  { %478 = vst [vmem:[%s687_s2 + $0x10] sm:$0xff] %v474_v52  ;;  %479 = vst [vmem:[%s687_s2 + $0x18] sm:$0xff] %v475_v53 }

</bundles_post_ra>
